<compile_context>
chip_gen: v5e
topology: v5e:2x2
jax: 0.10.0
libtpu: 0.0.40
codegen_flags: <defaults>
</compile_context>

<pallas_src>
import jax
import jax.numpy as jnp
from jax.experimental import pallas as pl
from jax.experimental.pallas import tpu as pltpu


def _make_film_kernel(k, seg_w):
    """Kernel factory.

    gb_ref  : (R, 2k)         packed per-row gamma (cols 0:k) and beta (cols k:2k)
    feat_ref: (R, k*seg_w)    lane-dense feature rows
    out_ref : (R, k*seg_w)
    """

    def kernel(gb_ref, feat_ref, out_ref):
        g = gb_ref[:, 0:k]
        b = gb_ref[:, k:2 * k]
        if k == 1:
            gf, bf = g, b  # (R, 1) lane-broadcasts against (R, seg_w)
        else:
            rblk = feat_ref.shape[0]
            gf = jnp.concatenate(
                [jnp.broadcast_to(g[:, j:j + 1], (rblk, seg_w)) for j in range(k)],
                axis=1)
            bf = jnp.concatenate(
                [jnp.broadcast_to(b[:, j:j + 1], (rblk, seg_w)) for j in range(k)],
                axis=1)
        out_ref[...] = (gf * feat_ref[...] + bf).astype(out_ref.dtype)

    return kernel


def _target_block_bytes():
    """Per-generation feature-block target (per buffer, before double-buffering)."""
    try:
        kind = jax.devices()[0].device_kind.lower()
    except Exception:  # pragma: no cover
        kind = ""
    if "v5 lite" in kind or "v5e" in kind or "v5lite" in kind:
        return 2 * 1024 * 1024   # v5e: 16 MiB default scoped VMEM -> stay small
    if "v7" in kind:
        return 8 * 1024 * 1024   # v7x: 3.2 TB/s HBM, fewer grid steps pays off
    return 4 * 1024 * 1024       # v6e / default


def _pick_row_tile(rows, row_bytes, target_block_bytes):
    """Row-tile: <= target bytes, multiple of 8 (unless full), cdiv-friendly,
    and >=2 grid steps whenever rows allow it (megacore sharding on v7x)."""
    cap = max(1, target_block_bytes // max(1, row_bytes))
    r = min(rows, cap)
    if r < rows:
        r = max(8, (r // 8) * 8)
    # Guarantee at least two grid steps when the row count permits it.
    if rows >= 16 and pl.cdiv(rows, r) < 2:
        half = (rows + 1) // 2
        r = max(8, (half // 8) * 8)
        if r >= rows:
            r = max(8, rows - 8)
    return r


def film_pallas(feat_nchw, txt, wg, bg, wb, bb, *, min_pallas_bytes=1 << 20):
    """FiLM: (txt@wg+bg)[:,:,None,None] * feat + (txt@wb+bb)[:,:,None,None].

    feat_nchw: (B, C, H, W); txt: (B, T); wg/wb: (T, C); bg/bb: (C,).
    Returns (B, C, H, W) in feat's dtype.
    """
    B, C, H, W = feat_nchw.shape
    HW = H * W
    rows = B * C
    itemsize = jnp.dtype(feat_nchw.dtype).itemsize

    # Tiny gamma/beta projection hoisted out of the kernel: one (B,T)@(T,2C) GEMM.
    w_gb = jnp.concatenate([wg, wb], axis=1)                    # (T, 2C)
    b_gb = jnp.concatenate([bg, bb], axis=0)                    # (2C,)
    param_dtype = feat_nchw.dtype if feat_nchw.dtype == jnp.bfloat16 else jnp.float32
    gb_bc = (jnp.asarray(txt, jnp.float32) @ jnp.asarray(w_gb, jnp.float32)
             + jnp.asarray(b_gb, jnp.float32)).astype(param_dtype)   # (B, 2C)
    gamma = gb_bc[:, :C].reshape(rows)                          # (B*C,)
    beta = gb_bc[:, C:].reshape(rows)                           # (B*C,)

    feat_bytes = rows * HW * itemsize
    if feat_bytes < min_pallas_bytes:
        # Tiny feature maps: let XLA fuse the elementwise op (launch overhead
        # would dominate a Pallas call).
        return (gamma.reshape(B, C, 1, 1) * feat_nchw
                + beta.reshape(B, C, 1, 1)).astype(feat_nchw.dtype)

    # ---- choose a lane-dense layout (free, contiguous reshapes only) ----
    if HW % 128 == 0:
        k, seg_w = 1, HW
        n_rows = rows
        feat2d = feat_nchw.reshape(n_rows, HW)
        gb = jnp.stack([gamma, beta], axis=1)                   # (rows, 2)
    elif HW < 128 and 128 % HW == 0 and rows % (128 // HW) == 0 and (128 // HW) <= 16:
        # Pack k consecutive channel-segments into each 128-lane slab row.
        k = 128 // HW
        seg_w = HW
        n_rows = rows // k
        feat2d = feat_nchw.reshape(n_rows, 128)
        gb = jnp.concatenate(
            [gamma.reshape(n_rows, k), beta.reshape(n_rows, k)], axis=1)  # (n_rows, 2k)
    else:
        # Generic fallback: correct, but lane-masked when HW is not 128-friendly.
        k, seg_w = 1, HW
        n_rows = rows
        feat2d = feat_nchw.reshape(n_rows, HW)
        gb = jnp.stack([gamma, beta], axis=1)

    lane_w = k * seg_w
    row_bytes = lane_w * itemsize
    R = _pick_row_tile(n_rows, row_bytes, _target_block_bytes())
    n_blocks = pl.cdiv(n_rows, R)   # partial last block is fine (masked edge writes)

    kernel = _make_film_kernel(k, seg_w)

    out2d = pl.pallas_call(
        kernel,
        out_shape=jax.ShapeDtypeStruct((n_rows, lane_w), feat_nchw.dtype),
        grid_spec=pltpu.PrefetchScalarGridSpec(
            num_scalar_prefetch=0,
            grid=(n_blocks,),
            in_specs=[
                pl.BlockSpec((R, 2 * k), lambda i: (i, 0)),       # packed gamma|beta
                pl.BlockSpec((R, lane_w), lambda i: (i, 0)),      # feature rows
            ],
            out_specs=pl.BlockSpec((R, lane_w), lambda i: (i, 0)),
        ),
        compiler_params=pltpu.CompilerParams(
            dimension_semantics=("parallel",),
            vmem_limit_bytes=48 * 1024 * 1024,
        ),
        cost_estimate=pl.CostEstimate(
            flops=2 * n_rows * lane_w,
            transcendentals=0,
            bytes_accessed=(2 * n_rows * lane_w * itemsize
                            + n_rows * 2 * k * jnp.dtype(param_dtype).itemsize),
        ),
    )(gb, feat2d)

    # (n_rows, lane_w) -> NCHW is again a free contiguous reshape.
    return out2d.reshape(B, C, H, W)


def film_reference(feat_nchw, txt, wg, bg, wb, bb):
    g = txt @ wg + bg            # (B, C)
    b = txt @ wb + bb            # (B, C)
    return g[:, :, None, None] * feat_nchw + b[:, :, None, None]


if __name__ == "__main__":
    key = jax.random.PRNGKey(0)
    txt_dim, C = 8, 4
    B = 2

    (k_feat, k_feat2, k_txt, k_wg, k_bg, k_wb, k_bb) = jax.random.split(key, 7)

    txt = jax.random.normal(k_txt, (B, txt_dim), dtype=jnp.float32)

    # nn.Linear-style deterministic init: uniform(-1/sqrt(in), 1/sqrt(in)).
    # Stored as (txt_dim, C) so the wrapper computes txt @ W directly
    # (equivalent to PyTorch's txt @ weight.T with weight (C, txt_dim)).
    bound = 1.0 / (txt_dim ** 0.5)
    wg = jax.random.uniform(k_wg, (txt_dim, C), jnp.float32, -bound, bound)
    bg = jax.random.uniform(k_bg, (C,), jnp.float32, -bound, bound)
    wb = jax.random.uniform(k_wb, (txt_dim, C), jnp.float32, -bound, bound)
    bb = jax.random.uniform(k_bb, (C,), jnp.float32, -bound, bound)

    # --- Test 1: HW = 256 (multiple of 128 -> simple lane-dense rows layout) ---
    H = W = 16
    feat = jax.random.normal(k_feat, (B, C, H, W), dtype=jnp.float32)
    out = film_pallas(feat, txt, wg, bg, wb, bb, min_pallas_bytes=0)
    out = jax.block_until_ready(out)
    ref = film_reference(feat, txt, wg, bg, wb, bb)
    assert out.shape == (B, C, H, W)
    assert jnp.allclose(out, ref, atol=1e-5, rtol=1e-5)

    # --- Test 2: HW = 64 < 128 (packed lane-dense slab, k = 2 segments/row) ---
    H2 = W2 = 8
    feat2 = jax.random.normal(k_feat2, (B, C, H2, W2), dtype=jnp.float32)
    out2 = film_pallas(feat2, txt, wg, bg, wb, bb, min_pallas_bytes=0)
    out2 = jax.block_until_ready(out2)
    ref2 = film_reference(feat2, txt, wg, bg, wb, bb)
    assert out2.shape == (B, C, H2, W2)
    assert jnp.allclose(out2, ref2, atol=1e-5, rtol=1e-5)

    print("KERNEL_OK")
</pallas_src>

<mosaic_0001>
module attributes {stable_mosaic.version = 11 : i64} {
  func.func @kernel(%arg0: i32, %arg1: memref<8x2xf32, #tpu.memory_space<vmem>>, %arg2: memref<8x256xf32, #tpu.memory_space<vmem>>, %arg3: memref<8x256xf32, #tpu.memory_space<vmem>>) attributes {dimension_semantics = [#tpu.dimension_semantics<parallel>], iteration_bounds = array<i64: 1>, scalar_prefetch = 0 : i64, scratch_operands = 0 : i64, tpu.core_type = #tpu.core_type<tc>, window_params = [{transform_indices = @transform_0, window_bounds = array<i64: 8, 2>}, {transform_indices = @transform_1, window_bounds = array<i64: 8, 256>}, {transform_indices = @transform_2, window_bounds = array<i64: 8, 256>}]} {
    %c0 = arith.constant 0 : index
    %c0_0 = arith.constant 0 : index
    %0 = vector.load %arg1[%c0, %c0_0] : memref<8x2xf32, #tpu.memory_space<vmem>>, vector<8x1xf32>
    %c0_1 = arith.constant 0 : index
    %c1 = arith.constant 1 : index
    %1 = vector.load %arg1[%c0_1, %c1] : memref<8x2xf32, #tpu.memory_space<vmem>>, vector<8x1xf32>
    %c0_2 = arith.constant 0 : index
    %c0_3 = arith.constant 0 : index
    %2 = vector.load %arg2[%c0_2, %c0_3] : memref<8x256xf32, #tpu.memory_space<vmem>>, vector<8x256xf32>
    %3 = vector.broadcast %0 : vector<8x1xf32> to vector<8x256xf32>
    %4 = arith.mulf %3, %2 : vector<8x256xf32>
    %5 = vector.broadcast %1 : vector<8x1xf32> to vector<8x256xf32>
    %6 = arith.addf %4, %5 : vector<8x256xf32>
    %c0_4 = arith.constant 0 : index
    %c0_5 = arith.constant 0 : index
    %7 = vector.load %arg3[%c0_4, %c0_5] : memref<8x256xf32, #tpu.memory_space<vmem>>, vector<8x256xf32>
    tpu.vector_store %arg3[%c0_4, %c0_5], %6 {strides = array<i32>} : memref<8x256xf32, #tpu.memory_space<vmem>>, vector<8x256xf32>,
    return
  }
  func.func @transform_0(%arg0: i32) -> (i32, i32) {
    %c0_i32 = arith.constant 0 : i32
    %c0_i32_0 = arith.constant 0 : i32
    return %arg0, %c0_i32 : i32, i32
  }
  func.func @transform_1(%arg0: i32) -> (i32, i32) {
    %c0_i32 = arith.constant 0 : i32
    %c0_i32_0 = arith.constant 0 : i32
    return %arg0, %c0_i32 : i32, i32
  }
  func.func @transform_2(%arg0: i32) -> (i32, i32) {
    %c0_i32 = arith.constant 0 : i32
    %c0_i32_0 = arith.constant 0 : i32
    return %arg0, %c0_i32 : i32, i32
  }
}

</mosaic_0001>

<bundles_post_ra>
// kernel: tpu_custom_call.1
= control target key start
LH: loop header
LB: loop body
LE: loop exit
PB: predicated region body
PF: predicated region fallthrough
CT: control target
= control target key end

     0   :  { %7 = vsyncpa [#allocation3], 0  ;;  %s147_s0 = inlined_call_operand.vmem [shape: f32[8,2], index: 0, kind: input, shape index: {}]   ;;  %s148_s1 = inlined_call_operand.hbm [shape: f32[8,256], index: 1, kind: input, shape index: {}]   ;;  %s149_s2 = inlined_call_operand.hbm [shape: f32[8,256], index: 2, kind: output, shape index: {}]  }
   0x1   :  { %8 = vsyncpa [#allocation4], 0  ;;  %s16_s11 = sshll.u32 %s148_s1, 4  ;;  %s119_s12 = smov [#allocation2]   ;;  %s17_s11 = int_to_ptr.hbm [resolvable:$true] %s16_s11 }
   0x2   :  { %s18_s13 = sshll.u32 %s119_s12, 4  ;;  %s19_s13 = int_to_ptr.vmem [resolvable:$true] %s18_s13 }
   0x3   :  { %21 = dma.hbm_to_vmem [thread:$0]  %s17_s11, 256, %s19_s13, [#allocation3]  }
   0x4   :  { %115 = dma.done.wait [#allocation3], 256  }
   0x5   :  { %116 = vsyncadd [#allocation3], 4294967040  ;;  %v120_v0 = vmov 0   ;;  %v26_v1 = vld [vmem:[%s147_s0] sm:$0xff]  ;;  %v121_v2 = vmov 1   ;;  %v28_v5 = vld [vmem:[#allocation2 + $0x8] sm:$0xff] }
   0x6   :  { %65 = vset.pattern.permute.xlu0 %v120_v0  ;;  %v27_v4 = vld [vmem:[#allocation2] sm:$0xff]  ;;  %s122_s1 = smov [#allocation5]   ;;  %s51_s19 = sshll.u32 %s149_s2, 4  ;;  %s52_s19 = int_to_ptr.hbm [resolvable:$true] %s51_s19 }
   0x7   :  { %31 = vperm.xlu0 %65, %v26_v1   ;;  %s49_s16 = sshll.u32 %s122_s1, 4  ;;  %s50_s16 = int_to_ptr.vmem [resolvable:$true] %s49_s16 }
   0xf   :  { %66 = vset.pattern.permute.xlu0 %v121_v2 }
  0x10   :  { %37 = vperm.xlu0 %66, %v26_v1  }
  0x79   :  { %v32_v3 = vpop.permute.xlu0 %31 }
  0x7a   :  { %v34_v6 = vmul.f32 %v32_v3, %v27_v4  ;;  %v35_v7 = vmul.f32 %v32_v3, %v28_v5 }
  0x82   :  { %v38_v8 = vpop.permute.xlu0 %37 }
  0x83   :  { %v40_v9 = vadd.f32 %v38_v8, %v34_v6  ;;  %v41_v10 = vadd.f32 %v38_v8, %v35_v7 }
  0x85   :  { %42 = vst [vmem:[#allocation5] sm:$0xff] %v40_v9 }
  0x86   :  { %43 = vst [vmem:[#allocation5 + $0x8] sm:$0xff] %v41_v10 }
  0x87   :  { %54 = dma.vmem_to_hbm [thread:$0]  %s50_s16, 256, %s52_s19, [#allocation4]  }
  0x88   :  { %117 = dma.done.wait [#allocation4], 256  }
  0x89   :  { %118 = vsyncadd [#allocation4], 4294967040 }
  0x8a   :  { %59 = vsyncpa [#allocation3], 1 }
  0x8b   :  { %60 = vsyncpa [#allocation4], 1 }

</bundles_post_ra>
